<compile_context>
chip_gen: v7x
topology: tpu7x:2x2x1
jax: 0.10.0
libtpu: 0.0.40
codegen_flags: <defaults>
</compile_context>

<pallas_src>
import math
import functools

import jax
import jax.numpy as jnp
from jax.experimental import pallas as pl
from jax.experimental.pallas import tpu as pltpu


class Expression:
    """Pallas analogue of the PyTorch `Expression` module: applies self.func(x)."""

    def __init__(self, func):
        self.func = func

    def __call__(self, x):
        return self.func(x)


def _round_up(x, m):
    return (x + m - 1) // m * m


def _vmem_capacity_bytes():
    """Per-core VMEM capacity; conservative 64 MiB (v7x) fallback."""
    try:
        info = pltpu.get_tpu_info()
        for attr in ("vmem_capacity_bytes", "vmem_size_bytes", "vmem_bytes"):
            v = getattr(info, attr, None)
            if v:
                return int(v)
    except Exception:
        pass
    return 64 * 1024 * 1024


def _ln_kernel(x_ref, w_ref, b_ref, o_ref, *, eps, inv_n):
    """General path: normalization axis is the lane axis."""
    x = x_ref[...].astype(jnp.float32)
    mean = jnp.sum(x, axis=-1, keepdims=True) * inv_n
    xc = x - mean
    # Two-pass (centered) variance: no cancellation, extra VPU pass is free slack.
    var = jnp.sum(xc * xc, axis=-1, keepdims=True) * inv_n
    y = xc * jax.lax.rsqrt(var + eps)
    o_ref[...] = (w_ref[...].astype(jnp.float32) * y
                  + b_ref[...].astype(jnp.float32)).astype(o_ref.dtype)


def _ln_fold_kernel(x_ref, w_ref, b_ref, g_ref, o_ref, *, eps, inv_n):
    """Lane-dense path for small hidden: `fold` logical rows packed into one
    128-wide lane row. g_ref is a (128,128) block-diagonal ones matrix, so
    x @ g broadcasts each group's sum back to every lane of that group
    (MXU, ~free in a memory-bound kernel, no cross-lane relayouts)."""
    x = x_ref[...].astype(jnp.float32)
    g = g_ref[...]
    mean = jnp.dot(x, g, preferred_element_type=jnp.float32) * inv_n
    xc = x - mean
    var = jnp.dot(xc * xc, g, preferred_element_type=jnp.float32) * inv_n
    y = xc * jax.lax.rsqrt(var + eps)
    o_ref[...] = (w_ref[...].astype(jnp.float32) * y
                  + b_ref[...].astype(jnp.float32)).astype(o_ref.dtype)


def layernorm(x, weight, bias, eps=1e-12, target_tile_bytes=8 * 1024 * 1024):
    """TF-style LayerNorm over the last axis. x: (..., hidden); weight/bias: (hidden,)."""
    orig_shape = x.shape
    hidden = orig_shape[-1]
    rows = int(math.prod(orig_shape[:-1]))
    x2 = x.reshape(rows, hidden)

    itemsize = jnp.dtype(x.dtype).itemsize
    sublane_pack = max(8, 32 // itemsize)  # 8 for f32, 16 for bf16, 32 for int8/fp8

    # Lane-dense packing: if hidden < 128, pack `fold` logical rows per 128-lane
    # row so the stored slab's last dim is exactly 128 (unmasked full-lane vst).
    if hidden < 128 and 128 % hidden == 0 and rows % (128 // hidden) == 0:
        fold = 128 // hidden
    else:
        fold = 1  # hidden ideally a multiple of 128 for unmasked lane-dense stores
    hidden_f = hidden * fold
    rows_f = rows // fold
    xf = x2.reshape(rows_f, hidden_f)
    wf = jnp.tile(weight, fold).reshape(1, hidden_f)
    bf = jnp.tile(bias, fold).reshape(1, hidden_f)

    # Per-generation VMEM budget.  Resident estimate per tile row:
    #   2x input block (double-buffered) + 2x output block + ~2 f32 working temps
    vmem_cap = _vmem_capacity_bytes()
    vmem_limit = min(int(vmem_cap * 0.9), 96 * 1024 * 1024)
    row_bytes = hidden_f * itemsize
    resident_row_bytes = hidden_f * (4 * itemsize + 8)

    # ~target_tile_bytes per input block (no artificial row cap), then clamp so
    # the resident working set stays within ~80% of the VMEM limit.
    tile_rows = max(1, target_tile_bytes // row_bytes)
    tile_rows = min(tile_rows, max(1, (vmem_limit * 4 // 5) // resident_row_bytes))

    # Keep >= 2 grid steps so the ("parallel",) row grid splits across both
    # TensorCores on v7x megacore.
    if rows_f >= 2 * sublane_pack:
        half = _round_up(-(-rows_f // 2), sublane_pack)
        tile_rows = min(tile_rows, half)

    if tile_rows >= rows_f or rows_f <= sublane_pack:
        tile_rows = rows_f  # single block equal to the full array (always legal)
    else:
        tile_rows = max(sublane_pack, (tile_rows // sublane_pack) * sublane_pack)

    # Ragged last block is masked by Pallas (no jnp.pad / output slice copies).
    grid = (pl.cdiv(rows_f, tile_rows),)

    compiler_params = pltpu.CompilerParams(
        dimension_semantics=("parallel",),   # megacore sharding of the row grid
        vmem_limit_bytes=int(vmem_limit),
    )

    inv_n = 1.0 / float(hidden)
    if fold == 1:
        kernel = functools.partial(_ln_kernel, eps=float(eps), inv_n=inv_n)
        in_specs = [
            pl.BlockSpec((tile_rows, hidden_f), lambda i: (i, 0)),
            # Constant index_map -> weight/bias stay resident in VMEM.
            pl.BlockSpec((1, hidden_f), lambda i: (0, 0)),
            pl.BlockSpec((1, hidden_f), lambda i: (0, 0)),
        ]
        operands = (xf, wf, bf)
    else:
        gidx = jnp.arange(hidden_f) // hidden
        gmat = (gidx[:, None] == gidx[None, :]).astype(jnp.float32)
        kernel = functools.partial(_ln_fold_kernel, eps=float(eps), inv_n=inv_n)
        in_specs = [
            pl.BlockSpec((tile_rows, hidden_f), lambda i: (i, 0)),
            pl.BlockSpec((1, hidden_f), lambda i: (0, 0)),
            pl.BlockSpec((1, hidden_f), lambda i: (0, 0)),
            pl.BlockSpec((hidden_f, hidden_f), lambda i: (0, 0)),
        ]
        operands = (xf, wf, bf, gmat)

    out = pl.pallas_call(
        kernel,
        out_shape=jax.ShapeDtypeStruct((rows_f, hidden_f), x.dtype),
        grid_spec=pltpu.PrefetchScalarGridSpec(
            num_scalar_prefetch=0,
            grid=grid,
            in_specs=in_specs,
            out_specs=pl.BlockSpec((tile_rows, hidden_f), lambda i: (i, 0)),
        ),
        compiler_params=compiler_params,
    )(*operands)

    return out.reshape(orig_shape)


if __name__ == "__main__":
    # Small shapes consistent with the module: batch=2, seq=8, hidden=32
    batch, seq, hidden = 2, 8, 32
    key = jax.random.PRNGKey(0)
    # Non-zero mean input exercises the (now two-pass) variance path.
    x = jax.random.normal(key, (batch, seq, hidden), dtype=jnp.float32) * 0.5 + 3.0

    # Deterministic parameters (LayerNorm init: weight=1, bias=0), TF-style eps.
    weight = jnp.ones((hidden,), dtype=jnp.float32)
    bias = jnp.zeros((hidden,), dtype=jnp.float32)
    eps = 1e-12

    # Expression(func): forward is just func(x) — here func is the Pallas LayerNorm.
    expr = Expression(lambda t: layernorm(t, weight, bias, eps=eps))
    out = expr(x)
    out = jax.block_until_ready(out)

    # Reference (pure JAX) check of the forward semantics.
    u = jnp.mean(x, axis=-1, keepdims=True)
    s = jnp.mean((x - u) ** 2, axis=-1, keepdims=True)
    ref = weight * ((x - u) / jnp.sqrt(s + eps)) + bias
    assert out.shape == x.shape and out.dtype == x.dtype
    assert jnp.allclose(out, ref, atol=1e-5, rtol=1e-5)

    print("KERNEL_OK")
</pallas_src>

<mosaic_0001>
module attributes {stable_mosaic.version = 11 : i64} {
  func.func @_ln_fold_kernel(%arg0: i32, %arg1: memref<4x128xf32, #tpu.memory_space<vmem>>, %arg2: memref<1x128xf32, #tpu.memory_space<vmem>>, %arg3: memref<1x128xf32, #tpu.memory_space<vmem>>, %arg4: memref<128x128xf32, #tpu.memory_space<vmem>>, %arg5: memref<4x128xf32, #tpu.memory_space<vmem>>) attributes {dimension_semantics = [#tpu.dimension_semantics<parallel>], iteration_bounds = array<i64: 1>, scalar_prefetch = 0 : i64, scratch_operands = 0 : i64, tpu.core_type = #tpu.core_type<tc>, window_params = [{transform_indices = @transform_0, window_bounds = array<i64: 4, 128>}, {pipeline_mode = #tpu.pipeline_mode<synchronous>, transform_indices = @transform_1, window_bounds = array<i64: 1, 128>}, {pipeline_mode = #tpu.pipeline_mode<synchronous>, transform_indices = @transform_2, window_bounds = array<i64: 1, 128>}, {pipeline_mode = #tpu.pipeline_mode<synchronous>, transform_indices = @transform_3, window_bounds = array<i64: 128, 128>}, {transform_indices = @transform_4, window_bounds = array<i64: 4, 128>}]} {
    %c0 = arith.constant 0 : index
    %c0_0 = arith.constant 0 : index
    %0 = vector.load %arg1[%c0, %c0_0] : memref<4x128xf32, #tpu.memory_space<vmem>>, vector<4x128xf32>
    %c0_1 = arith.constant 0 : index
    %c0_2 = arith.constant 0 : index
    %1 = vector.load %arg4[%c0_1, %c0_2] : memref<128x128xf32, #tpu.memory_space<vmem>>, vector<128x128xf32>
    %cst = arith.constant dense<0.000000e+00> : vector<4x128xf32>
    %2 = tpu.matmul %0, %1, %cst {dimension_numbers = #tpu.dot_dimension_numbers<[1], [0], [0], [1], [0, 0, 1, 1], [], []>} : vector<4x128xf32>, vector<128x128xf32>, vector<4x128xf32> -> vector<4x128xf32>
    %cst_3 = arith.constant 3.125000e-02 : f32
    %3 = vector.broadcast %cst_3 : f32 to vector<4x128xf32>
    %4 = arith.mulf %2, %3 : vector<4x128xf32>
    %5 = arith.subf %0, %4 : vector<4x128xf32>
    %6 = arith.mulf %5, %5 : vector<4x128xf32>
    %cst_4 = arith.constant dense<0.000000e+00> : vector<4x128xf32>
    %7 = tpu.matmul %6, %1, %cst_4 {dimension_numbers = #tpu.dot_dimension_numbers<[1], [0], [0], [1], [0, 0, 1, 1], [], []>} : vector<4x128xf32>, vector<128x128xf32>, vector<4x128xf32> -> vector<4x128xf32>
    %cst_5 = arith.constant 3.125000e-02 : f32
    %8 = vector.broadcast %cst_5 : f32 to vector<4x128xf32>
    %9 = arith.mulf %7, %8 : vector<4x128xf32>
    %cst_6 = arith.constant 9.99999996E-13 : f32
    %10 = vector.broadcast %cst_6 : f32 to vector<4x128xf32>
    %11 = arith.addf %9, %10 : vector<4x128xf32>
    %12 = math.rsqrt %11 : vector<4x128xf32>
    %13 = arith.mulf %5, %12 : vector<4x128xf32>
    %c0_7 = arith.constant 0 : index
    %c0_8 = arith.constant 0 : index
    %14 = vector.load %arg2[%c0_7, %c0_8] : memref<1x128xf32, #tpu.memory_space<vmem>>, vector<1x128xf32>
    %15 = vector.broadcast %14 : vector<1x128xf32> to vector<4x128xf32>
    %16 = arith.mulf %15, %13 : vector<4x128xf32>
    %c0_9 = arith.constant 0 : index
    %c0_10 = arith.constant 0 : index
    %17 = vector.load %arg3[%c0_9, %c0_10] : memref<1x128xf32, #tpu.memory_space<vmem>>, vector<1x128xf32>
    %18 = vector.broadcast %17 : vector<1x128xf32> to vector<4x128xf32>
    %19 = arith.addf %16, %18 : vector<4x128xf32>
    %c0_11 = arith.constant 0 : index
    %c0_12 = arith.constant 0 : index
    %20 = vector.load %arg5[%c0_11, %c0_12] : memref<4x128xf32, #tpu.memory_space<vmem>>, vector<4x128xf32>
    tpu.vector_store %arg5[%c0_11, %c0_12], %19 {strides = array<i32>} : memref<4x128xf32, #tpu.memory_space<vmem>>, vector<4x128xf32>,
    return
  }
  func.func @transform_0(%arg0: i32) -> (i32, i32) {
    %c0_i32 = arith.constant 0 : i32
    %c0_i32_0 = arith.constant 0 : i32
    return %arg0, %c0_i32 : i32, i32
  }
  func.func @transform_1(%arg0: i32) -> (i32, i32) {
    %c0_i32 = arith.constant 0 : i32
    %c0_i32_0 = arith.constant 0 : i32
    %c0_i32_1 = arith.constant 0 : i32
    return %c0_i32, %c0_i32_0 : i32, i32
  }
  func.func @transform_2(%arg0: i32) -> (i32, i32) {
    %c0_i32 = arith.constant 0 : i32
    %c0_i32_0 = arith.constant 0 : i32
    %c0_i32_1 = arith.constant 0 : i32
    return %c0_i32, %c0_i32_0 : i32, i32
  }
  func.func @transform_3(%arg0: i32) -> (i32, i32) {
    %c0_i32 = arith.constant 0 : i32
    %c0_i32_0 = arith.constant 0 : i32
    %c0_i32_1 = arith.constant 0 : i32
    return %c0_i32, %c0_i32_0 : i32, i32
  }
  func.func @transform_4(%arg0: i32) -> (i32, i32) {
    %c0_i32 = arith.constant 0 : i32
    %c0_i32_0 = arith.constant 0 : i32
    return %arg0, %c0_i32 : i32, i32
  }
}

</mosaic_0001>

<bundles_post_ra>
// kernel: tpu_custom_call.1
= control target key start
LH: loop header
LB: loop body
LE: loop exit
PB: predicated region body
PF: predicated region fallthrough
CT: control target
= control target key end

     0   :  { %9 = vsyncpa [#allocation3], 0  ;;  %s559_s0 = inlined_call_operand.hbm [shape: f32[4,128], index: 0, kind: input, shape index: {}]   ;;  %s560_s1 = inlined_call_operand.vmem [shape: f32[1,128], index: 1, kind: input, shape index: {}]   ;;  %s561_s2 = inlined_call_operand.vmem [shape: f32[1,128], index: 2, kind: input, shape index: {}]   ;;  %s562_s3 = inlined_call_operand.hbm [shape: f32[128,128], index: 3, kind: input, shape index: {}]   ;;  %s563_s4 = inlined_call_operand.hbm [shape: f32[4,128], index: 4, kind: output, shape index: {}]  }
   0x1   :  { %10 = vsyncpa [#allocation6], 0 }
   0x2   :  { %11 = vsyncpa [#allocation4], 0  ;;  %s477_s15 = smov [#allocation2]   ;;  %s478_s17 = smov [#allocation5]  }
   0x3   :  { %s18_s16 = sshll.u32 %s477_s15, 4  ;;  %s31_s18 = sshll.u32 %s478_s17, 4  ;;  %s19_s16 = int_to_ptr.vmem [resolvable:$true] %s18_s16  ;;  %s510_s18 = int_to_ptr.vmem [resolvable:$true] %s31_s18 }
   0x4   :  { %s405_s21 = scalar_lea.hbm %s559_s0, 64 }
   0x5   :  { %p406_p0 = scmp.ne.s32.totalorder %s559_s0, %s405_s21  ;;  %p409_p1 = scmp.lt.u32.totalorder %s405_s21, %s559_s0 }
   0x7   :  { %p411_p2 = pnand %p409_p1, %p406_p0 }
   0x9   :  { %414 = shalt.err (!%p411_p2)
}
   0xa   :  { %s415_s26 = scalar_lea.vmem %s19_s16, 64  ;;  %p420_p4 = scmp.lt.s32.totalorder %s19_s16, %s19_s16 }
   0xb   :  { %p416_p3 = scmp.ne.s32.totalorder %s19_s16, %s415_s26  ;;  %p421_p5 = scmp.lt.s32.totalorder %s415_s26, %s415_s26 }
   0xd   :  { %p422_p6 = por %p421_p5, %p420_p4 }
   0xf   :  { %p423_p7 = pnand %p422_p6, %p416_p3 }
  0x11   :  { %426 = shalt.err (!%p423_p7)
}
  0x12   :  { %21 = dma.hbm_to_vmem [thread:$0]  %s559_s0, 64, %s19_s16, [#allocation3]  }
  0x13   :  { %s427_s5 = scalar_lea.hbm %s562_s3, 2048 }
  0x14   :  { %p428_p8 = scmp.ne.s32.totalorder %s562_s3, %s427_s5  ;;  %p431_p9 = scmp.lt.u32.totalorder %s427_s5, %s562_s3 }
  0x16   :  { %p433_p10 = pnand %p431_p9, %p428_p8 }
  0x18   :  { %436 = shalt.err (!%p433_p10)
}
  0x19   :  { %s437_s10 = scalar_lea.vmem %s510_s18, 2048  ;;  %p442_p12 = scmp.lt.s32.totalorder %s510_s18, %s510_s18 }
  0x1a   :  { %p438_p11 = scmp.ne.s32.totalorder %s510_s18, %s437_s10  ;;  %p443_p13 = scmp.lt.s32.totalorder %s437_s10, %s437_s10 }
  0x1c   :  { %p444_p0 = por %p443_p13, %p442_p12 }
  0x1e   :  { %p445_p1 = pnand %p444_p0, %p438_p11 }
  0x20   :  { %448 = shalt.err (!%p445_p1)
}
  0x21   :  { %s479_s0 = smov 128   ;;  %s480_s11 = smov 8  }
  0x22   :  { %37 = dma.hbm_to_vmem [thread:$0]  %s562_s3, 2048, %s510_s18, [#allocation6], %s479_s0, %s479_s0, %s480_s11  }
  0x23   :  { %471 = dma.done.wait [#allocation3], 64  }
  0x24   :  { %472 = vsyncadd [#allocation3], 4294967232 }
  0x25   :  { %473 = dma.done.wait [#allocation6], 2048  }
  0x26   :  { %474 = vsyncadd [#allocation6], 4294965248  ;;  %v481_v0 = vmov 0.0|0.0   ;;  %vm482_vm0 = vmmov 0   ;;  %v483_v1 = vmov 0.0   ;;  %v45_v2 = vld [vmem:[#allocation5] sm:$0xff] }
  0x27   :  { %347 = vmatprep.subr.bf16.mxu0 %v481_v0  ;;  %309 = vmatprep.mubr.msk.f32.mxu0 %vm482_vm0, %v483_v1  ;;  %v46_v3 = vld [vmem:[#allocation5 + $0x8] sm:$0xff]  ;;  %v47_v4 = vld [vmem:[#allocation5 + $0x10] sm:$0xff]  ;;  %v48_v6 = vld [vmem:[#allocation5 + $0x18] sm:$0xff]  ;;  %s484_s17 = smov [#allocation7]  }
  0x28   :  { %371 = vmatprep.subr.bf16.mxu1 %v481_v0  ;;  %344 = vmatprep.mubr.msk.f32.mxu1 %vm482_vm0, %v483_v1  ;;  %v348_v5 = vpack.c.bf16 %v46_v3, %v45_v2  ;;  %v351_v7 = vpack.c.bf16 %v48_v6, %v47_v4  ;;  %v49_v8 = vld [vmem:[#allocation5 + $0x20] sm:$0xff]  ;;  %v50_v9 = vld [vmem:[#allocation5 + $0x28] sm:$0xff]  ;;  %v51_v11 = vld [vmem:[#allocation5 + $0x30] sm:$0xff]  ;;  %s231_s18 = sshll.u32 %s484_s17, 4  ;;  %s232_s18 = int_to_ptr.vmem [resolvable:$true] %s231_s18 }
  0x29   :  { %v354_v10 = vpack.c.bf16 %v50_v9, %v49_v8  ;;  %v52_v12 = vld [vmem:[#allocation5 + $0x38] sm:$0xff]  ;;  %v53_v14 = vld [vmem:[#allocation5 + $0x40] sm:$0xff]  ;;  %v54_v15 = vld [vmem:[#allocation5 + $0x48] sm:$0xff]  ;;  %s449_s19 = scalar_lea.vmem %s232_s18, 64  ;;  %p454_p3 = scmp.lt.s32.totalorder %s232_s18, %s232_s18 }
  0x2a   :  { %349 = vmatpush3.bf16.msra.mxu0 %v348_v5  ;;  %373 = vmatpush3.bf16.msra.mxu1 %v348_v5  ;;  %v357_v13 = vpack.c.bf16 %v52_v12, %v51_v11  ;;  %v360_v16 = vpack.c.bf16 %v54_v15, %v53_v14  ;;  %v55_v17 = vld [vmem:[#allocation5 + $0x50] sm:$0xff]  ;;  %v56_v18 = vld [vmem:[#allocation5 + $0x58] sm:$0xff]  ;;  %v57_v20 = vld [vmem:[#allocation5 + $0x60] sm:$0xff]  ;;  %p450_p2 = scmp.ne.s32.totalorder %s232_s18, %s449_s19  ;;  %p455_p4 = scmp.lt.s32.totalorder %s449_s19, %s449_s19 }
  0x2b   :  { %350 = vmatprep.subr.bf16.mxu0 %v481_v0  ;;  %374 = vmatprep.subr.bf16.mxu1 %v481_v0  ;;  %v363_v19 = vpack.c.bf16 %v56_v18, %v55_v17  ;;  %v58_v21 = vld [vmem:[#allocation5 + $0x68] sm:$0xff]  ;;  %v59_v23 = vld [vmem:[#allocation5 + $0x70] sm:$0xff]  ;;  %v60_v24 = vld [vmem:[#allocation5 + $0x78] sm:$0xff] }
  0x2c   :  { %v366_v22 = vpack.c.bf16 %v58_v21, %v57_v20  ;;  %v369_v25 = vpack.c.bf16 %v60_v24, %v59_v23  ;;  %v44_v26 = vld [vmem:[#allocation2] sm:$0xf]  ;;  %p456_p5 = por %p455_p4, %p454_p3 }
  0x2d   :  { %v241_v37 = vld [vmem:[%s560_s1] ss:$0 sm:$0xff] }
  0x2e   :  { %352 = vmatpush3.bf16.msra.mxu0 %v351_v7  ;;  %376 = vmatpush3.bf16.msra.mxu1 %v351_v7  ;;  %v242_v39 = vld [vmem:[%s561_s2] ss:$0 sm:$0xff]  ;;  %p457_p6 = pnand %p456_p5, %p450_p2 }
  0x2f   :  { %353 = vmatprep.subr.bf16.mxu0 %v481_v0  ;;  %377 = vmatprep.subr.bf16.mxu1 %v481_v0 }
  0x32   :  { %355 = vmatpush3.bf16.msra.mxu0 %v354_v10  ;;  %379 = vmatpush3.bf16.msra.mxu1 %v354_v10 }
  0x33   :  { %356 = vmatprep.subr.bf16.mxu0 %v481_v0  ;;  %380 = vmatprep.subr.bf16.mxu1 %v481_v0 }
  0x36   :  { %358 = vmatpush3.bf16.msra.mxu0 %v357_v13  ;;  %382 = vmatpush3.bf16.msra.mxu1 %v357_v13 }
  0x37   :  { %359 = vmatprep.subr.bf16.mxu0 %v481_v0  ;;  %383 = vmatprep.subr.bf16.mxu1 %v481_v0 }
  0x3a   :  { %361 = vmatpush3.bf16.msra.mxu0 %v360_v16  ;;  %385 = vmatpush3.bf16.msra.mxu1 %v360_v16 }
  0x3b   :  { %362 = vmatprep.subr.bf16.mxu0 %v481_v0  ;;  %386 = vmatprep.subr.bf16.mxu1 %v481_v0 }
  0x3e   :  { %364 = vmatpush3.bf16.msra.mxu0 %v363_v19  ;;  %388 = vmatpush3.bf16.msra.mxu1 %v363_v19 }
  0x3f   :  { %365 = vmatprep.subr.bf16.mxu0 %v481_v0  ;;  %389 = vmatprep.subr.bf16.mxu1 %v481_v0 }
  0x42   :  { %367 = vmatpush3.bf16.msra.mxu0 %v366_v22  ;;  %391 = vmatpush3.bf16.msra.mxu1 %v366_v22 }
  0x43   :  { %368 = vmatprep.subr.bf16.mxu0 %v481_v0  ;;  %392 = vmatprep.subr.bf16.mxu1 %v481_v0 }
  0x46   :  { %370 = vmatpush3.bf16.msra.mxu0 %v369_v25  ;;  %394 = vmatpush3.bf16.msra.mxu1 %v369_v25 }
  0x49   :  { %310 = vmatmul.mubr.f32.vlgmr.msra.gmra.mrb[0].mxu0 %v44_v26 }
 0x11c   :  { %v127_v27 = vpop.f32.mrb[0].mxu0 }
 0x11d   :  { %v131_v28 = vmul.f32 0.03125, %v127_v27  ;;  %v311_v29 = vpop.f32.mrb[1].mxu0 }
 0x11f   :  { %v132_v30 = vsub.f32 %v44_v26, %v131_v28 }
 0x121   :  { %v133_v31 = vmul.f32 %v132_v30, %v132_v30 }
 0x123   :  { %345 = vmatmul.mubr.f32.vlgmr.msra.gmra.mrb[0].mxu1 %v133_v31 }
 0x1f6   :  { %v200_v32 = vpop.f32.mrb[0].mxu1 }
 0x1f7   :  { %v204_v33 = vmul.f32 0.03125, %v200_v32  ;;  %v346_v34 = vpop.f32.mrb[1].mxu1 }
 0x1f9   :  { %v205_v35 = vadd.f32 1e-12, %v204_v33 }
 0x1fb   :  { %403 = vrsqrt.f32 %v205_v35 }
 0x205   :  { %v404_v36 = vpop.eup %403 }
 0x206   :  { %v207_v38 = vmul.f32 %v404_v36, %v132_v30 }
 0x208   :  { %v215_v40 = vmul.f32 %v241_v37, %v207_v38 }
 0x20a   :  { %v223_v41 = vadd.f32 %v242_v39, %v215_v40 }
 0x20c   :  { %224 = vst [vmem:[#allocation7] sm:$0xf] %v223_v41 }
 0x20d   :  { %460 = shalt.err (!%p457_p6)
}
 0x20e   :  { %s461_s21 = scalar_lea.hbm %s563_s4, 64 }
 0x20f   :  { %p462_p7 = scmp.ne.s32.totalorder %s563_s4, %s461_s21  ;;  %p465_p8 = scmp.lt.u32.totalorder %s461_s21, %s563_s4 }
 0x211   :  { %p467_p9 = pnand %p465_p8, %p462_p7 }
 0x213   :  { %470 = shalt.err (!%p467_p9)
}
 0x214   :  { %234 = dma.vmem_to_hbm [thread:$0]  %s232_s18, 64, %s563_s4, [#allocation4]  }
 0x215   :  { %475 = dma.done.wait [#allocation4], 64  }
 0x216   :  { %476 = vsyncadd [#allocation4], 4294967232 }
 0x217   :  { %238 = vsyncpa [#allocation3], 1 }
 0x218   :  { %239 = vsyncpa [#allocation6], 1 }
 0x219   :  { %240 = vsyncpa [#allocation4], 1 }

</bundles_post_ra>
